<compile_context>
chip_gen: v5e
topology: v5e:2x2
jax: 0.10.0
libtpu: 0.0.40
codegen_flags: <defaults>
</compile_context>

<pallas_src>
import functools

import jax
import jax.numpy as jnp
from jax.experimental import pallas as pl
from jax.experimental.pallas import tpu as pltpu

_LANE = 128  # lane width (last dim)


def _round_up(x, m):
    return (x + m - 1) // m * m


def _cdiv(a, b):
    return (a + b - 1) // b


def _tpu_generation():
    """Returns (vmem_capacity_bytes, num_tensorcores) with conservative fallbacks."""
    vmem_bytes, n_tc = 64 * 2 ** 20, 1  # conservative default (v7x-like per-TC VMEM)
    try:
        kind = jax.devices()[0].device_kind.lower()
    except Exception:
        kind = ""
    if any(t in kind for t in ("v5 lite", "v5lite", "v5e", "v6 lite", "v6lite", "v6e")):
        vmem_bytes, n_tc = 128 * 2 ** 20, 1       # v5e / v6e: 128 MiB VMEM, single TC
    elif any(t in kind for t in ("v7", "7x")):
        vmem_bytes, n_tc = 64 * 2 ** 20, 2        # v7x: 64 MiB per TC, 2 TCs per chip
    elif any(t in kind for t in ("v3", "v4", "v5p", "v5")):
        vmem_bytes, n_tc = 128 * 2 ** 20, 2       # megacore generations
    try:
        cap = getattr(pltpu.get_tpu_info(), "vmem_capacity_bytes", None)
        if isinstance(cap, int) and cap > 0:
            vmem_bytes = cap
    except Exception:
        pass
    return vmem_bytes, n_tc


def _autoencoder_kernel(x_ref,
                        w1_ref, b1_ref,
                        w2_ref, b2_ref,
                        w3_ref, b3_ref,
                        w4_ref, b4_ref,
                        o_ref):
    """Fused relu(relu(relu(relu(x@W1+b1)@W2+b2)@W3+b3)@W4+b4) on one batch tile."""

    def layer(h, w_ref, b_ref):
        # In-kernel cast to the weights' dtype (bf16 fast path), f32 MXU accumulation.
        lhs = h if h.dtype == w_ref.dtype else h.astype(w_ref.dtype)
        y = jnp.dot(lhs, w_ref[...], preferred_element_type=jnp.float32) + b_ref[...]
        # TODO(synk): on v6e/v7x (bf16 VPU) a bf16 bias-add/ReLU path would cut VALU work
        # when compute-bound; kept in f32 for v5e and tighter numerics.
        return jnp.maximum(y, 0.0)

    h = x_ref[...]
    h = layer(h, w1_ref, b1_ref)
    h = layer(h, w2_ref, b2_ref)   # "encoded"
    h = layer(h, w3_ref, b3_ref)
    h = layer(h, w4_ref, b4_ref)   # "decoded"
    o_ref[...] = h.astype(o_ref.dtype)


@functools.partial(
    jax.jit,
    static_argnames=("batch_tile", "use_bf16_matmul", "use_pipeline_modes"))
def autoencoder_relu_forward(x, params, *, batch_tile=512, use_bf16_matmul=True,
                             use_pipeline_modes=True):
    """x: (B, input_dim) f32. params: w{k} shaped (in, out), b{k} shaped (1, out), f32."""
    B, D = x.shape
    mm_dtype = jnp.bfloat16 if use_bf16_matmul else x.dtype
    mm_bytes = jnp.dtype(mm_dtype).itemsize
    row_align = 16 if mm_bytes == 2 else 8   # bf16 packs 16 rows per sublane group

    # Weights cast once in the wrapper (small, reused by every batch tile); x stays f32
    # and un-padded so its HBM traffic is a single f32 read per element.
    ws = [params[f"w{k}"].astype(mm_dtype) for k in range(1, 5)]
    bs = [params[f"b{k}"].reshape(1, -1).astype(jnp.float32) for k in range(1, 5)]

    feat = [D] + [w.shape[1] for w in ws]
    max_feat = max(_round_up(f, _LANE) for f in feat)

    vmem_phys, n_tc = _tpu_generation()
    vmem_cap = int(0.85 * vmem_phys)   # ~15% headroom for Mosaic internal scratch / spills

    def vmem_needed(tb):
        x_bufs = 3 if use_pipeline_modes else 2     # x tile, up to triple buffered
        w_bufs = 1 if use_pipeline_modes else 2     # resident weights, single buffered
        need = x_bufs * tb * _round_up(D, _LANE) * 4            # f32 x tiles
        need += 2 * tb * _round_up(D, _LANE) * 4                 # f32 out tiles (double buffered)
        for w in ws:
            fi, fo = w.shape
            need += w_bufs * _round_up(fi, row_align) * _round_up(fo, _LANE) * mm_bytes
            need += w_bufs * 8 * _round_up(fo, _LANE) * 4        # bias (one sublane tile)
        need += 3 * tb * max_feat * (4 + mm_bytes)               # live f32 h + bf16 matmul copies
        return need

    # Biggest batch tile that fits the per-generation VMEM budget.
    tb = _round_up(min(batch_tile, _round_up(B, row_align)), row_align)
    while tb > row_align and vmem_needed(tb) > vmem_cap:
        tb = _round_up(_cdiv(tb, 2), row_align)
    # Only force a >=2-tile split on chips with 2 TensorCores (v7x); on single-TC v5e/v6e
    # the split is a sequential loop and pure per-grid-step overhead.
    if n_tc >= 2 and _cdiv(B, tb) < n_tc and B > row_align:
        tb = _round_up(_cdiv(B, n_tc), row_align)
    grid = (_cdiv(B, tb),)

    vmem_limit = int(min(vmem_cap, max(32 * 2 ** 20, 2 * vmem_needed(tb))))

    def resident(a):
        nd = a.ndim
        if use_pipeline_modes:
            return pl.BlockSpec(a.shape, lambda i: (0,) * nd, pipeline_mode=pl.Buffered(1))
        return pl.BlockSpec(a.shape, lambda i: (0,) * nd)

    # Deeper prefetch on x only pays when the grid is long; keep default double buffering
    # otherwise (and when pipeline modes are disabled).
    if use_pipeline_modes and grid[0] >= 4:
        x_spec = pl.BlockSpec((tb, D), lambda i: (i, 0), pipeline_mode=pl.Buffered(3))
    else:
        x_spec = pl.BlockSpec((tb, D), lambda i: (i, 0))

    in_specs = [x_spec]
    for w, b in zip(ws, bs):
        in_specs += [resident(w), resident(b)]

    i1, i2 = ws[0].shape[1], ws[1].shape[1]
    flops = 2 * B * (D * i1 + i1 * i2 + i2 * i1 + i1 * D)
    bytes_accessed = int(2 * B * D * 4
                         + sum(w.size * mm_bytes for w in ws)
                         + sum(b.size * 4 for b in bs))

    out = pl.pallas_call(
        _autoencoder_kernel,
        out_shape=jax.ShapeDtypeStruct((B, D), x.dtype),
        grid_spec=pltpu.PrefetchScalarGridSpec(
            num_scalar_prefetch=0,
            grid=grid,
            in_specs=in_specs,
            out_specs=pl.BlockSpec((tb, D), lambda i: (i, 0)),
        ),
        compiler_params=pltpu.CompilerParams(
            dimension_semantics=("parallel",),
            vmem_limit_bytes=vmem_limit,
        ),
        cost_estimate=pl.CostEstimate(
            flops=flops, transcendentals=0, bytes_accessed=bytes_accessed),
    )(x, *[a for pair in zip(ws, bs) for a in pair])

    # TODO(synk): once vmem_needed(row_align) > vmem_cap (input_dim ≳ 3-4k on v7x with bf16
    # weights), stream W1/W4 over an "arbitrary" reduction grid axis with a VMEM f32 accumulator
    # (pl.when init/finalize), or quantize the weights to fp8 on v7x, instead of full residency.
    return out


def init_params(key, input_dim):
    """Deterministic init mimicking nn.Linear's default U(-1/sqrt(fan_in), 1/sqrt(fan_in))."""
    inter1 = int(0.67 * input_dim)
    inter2 = int(0.33 * input_dim)
    dims = [(input_dim, inter1), (inter1, inter2), (inter2, inter1), (inter1, input_dim)]
    params = {}
    keys = jax.random.split(key, 2 * len(dims))
    for idx, (fan_in, fan_out) in enumerate(dims):
        bound = 1.0 / jnp.sqrt(float(fan_in))
        w = jax.random.uniform(keys[2 * idx], (fan_in, fan_out),
                               minval=-bound, maxval=bound, dtype=jnp.float32)
        b = jax.random.uniform(keys[2 * idx + 1], (1, fan_out),
                               minval=-bound, maxval=bound, dtype=jnp.float32)
        params[f"w{idx + 1}"] = w
        params[f"b{idx + 1}"] = b
    return params


def reference_forward(x, params):
    """Pure-JAX f32 reference of the PyTorch forward."""
    h = x
    for k in range(1, 5):
        h = jnp.maximum(h @ params[f"w{k}"] + params[f"b{k}"], 0.0)
    return h


if __name__ == "__main__":
    key = jax.random.PRNGKey(0)
    k_param, k_x = jax.random.split(key)

    input_dim = 32    # -> inter1 = 21, inter2 = 10 (matches int(0.67*D), int(0.33*D))
    batch = 64        # exercises the 2-TC split path on v7x (tb=32, grid=(2,)); grid=(1,) elsewhere

    params = init_params(k_param, input_dim)
    x = jax.random.normal(k_x, (batch, input_dim), dtype=jnp.float32)
    ref = reference_forward(x, params)

    def run(**kw):
        o32 = jax.block_until_ready(
            autoencoder_relu_forward(x, params, use_bf16_matmul=False, **kw))
        obf = jax.block_until_ready(
            autoencoder_relu_forward(x, params, use_bf16_matmul=True, **kw))
        return o32, obf

    try:
        out_f32, out_bf16 = run(use_pipeline_modes=True)
    except Exception:
        # pl.Buffered pipeline_mode unavailable on this jax build: fall back to default
        # double buffering; everything else unchanged.
        out_f32, out_bf16 = run(use_pipeline_modes=False)

    assert out_f32.shape == (batch, input_dim)
    assert jnp.allclose(out_f32, ref, atol=1e-5, rtol=1e-5), "f32 kernel mismatch vs reference"

    # bf16 matmul error grows ~sqrt(contraction dim); scale tolerance with input_dim.
    tol = 3e-2 * max(1.0, (input_dim / 32.0) ** 0.5)
    assert out_bf16.shape == (batch, input_dim)
    assert jnp.allclose(out_bf16, ref, atol=tol, rtol=tol), "bf16 kernel mismatch vs reference"

    print("KERNEL_OK")
</pallas_src>

<mosaic_0001>
module attributes {stable_mosaic.version = 11 : i64} {
  func.func @_autoencoder_kernel(%arg0: i32, %arg1: memref<64x32xf32, #tpu.memory_space<vmem>>, %arg2: memref<32x21xf32, #tpu.memory_space<vmem>>, %arg3: memref<1x21xf32, #tpu.memory_space<vmem>>, %arg4: memref<21x10xf32, #tpu.memory_space<vmem>>, %arg5: memref<1x10xf32, #tpu.memory_space<vmem>>, %arg6: memref<10x21xf32, #tpu.memory_space<vmem>>, %arg7: memref<1x21xf32, #tpu.memory_space<vmem>>, %arg8: memref<21x32xf32, #tpu.memory_space<vmem>>, %arg9: memref<1x32xf32, #tpu.memory_space<vmem>>, %arg10: memref<64x32xf32, #tpu.memory_space<vmem>>) attributes {dimension_semantics = [#tpu.dimension_semantics<parallel>], iteration_bounds = array<i64: 1>, scalar_prefetch = 0 : i64, scratch_operands = 0 : i64, tpu.core_type = #tpu.core_type<tc>, window_params = [{transform_indices = @transform_0, window_bounds = array<i64: 64, 32>}, {pipeline_mode = #tpu.pipeline_mode<synchronous>, transform_indices = @transform_1, window_bounds = array<i64: 32, 21>}, {pipeline_mode = #tpu.pipeline_mode<synchronous>, transform_indices = @transform_2, window_bounds = array<i64: 1, 21>}, {pipeline_mode = #tpu.pipeline_mode<synchronous>, transform_indices = @transform_3, window_bounds = array<i64: 21, 10>}, {pipeline_mode = #tpu.pipeline_mode<synchronous>, transform_indices = @transform_4, window_bounds = array<i64: 1, 10>}, {pipeline_mode = #tpu.pipeline_mode<synchronous>, transform_indices = @transform_5, window_bounds = array<i64: 10, 21>}, {pipeline_mode = #tpu.pipeline_mode<synchronous>, transform_indices = @transform_6, window_bounds = array<i64: 1, 21>}, {pipeline_mode = #tpu.pipeline_mode<synchronous>, transform_indices = @transform_7, window_bounds = array<i64: 21, 32>}, {pipeline_mode = #tpu.pipeline_mode<synchronous>, transform_indices = @transform_8, window_bounds = array<i64: 1, 32>}, {transform_indices = @transform_9, window_bounds = array<i64: 64, 32>}]} {
    %c0 = arith.constant 0 : index
    %c0_0 = arith.constant 0 : index
    %0 = vector.load %arg1[%c0, %c0_0] : memref<64x32xf32, #tpu.memory_space<vmem>>, vector<64x32xf32>
    %c0_1 = arith.constant 0 : index
    %c0_2 = arith.constant 0 : index
    %1 = vector.load %arg2[%c0_1, %c0_2] : memref<32x21xf32, #tpu.memory_space<vmem>>, vector<32x21xf32>
    %cst = arith.constant dense<0.000000e+00> : vector<64x21xf32>
    %2 = tpu.matmul %0, %1, %cst {dimension_numbers = #tpu.dot_dimension_numbers<[1], [0], [0], [1], [0, 0, 1, 1], [], []>} : vector<64x32xf32>, vector<32x21xf32>, vector<64x21xf32> -> vector<64x21xf32>
    %c0_3 = arith.constant 0 : index
    %c0_4 = arith.constant 0 : index
    %3 = vector.load %arg3[%c0_3, %c0_4] : memref<1x21xf32, #tpu.memory_space<vmem>>, vector<1x21xf32>
    %4 = vector.broadcast %3 : vector<1x21xf32> to vector<64x21xf32>
    %5 = arith.addf %2, %4 : vector<64x21xf32>
    %cst_5 = arith.constant 0.000000e+00 : f32
    %6 = vector.broadcast %cst_5 : f32 to vector<64x21xf32>
    %7 = arith.maximumf %5, %6 : vector<64x21xf32>
    %c0_6 = arith.constant 0 : index
    %c0_7 = arith.constant 0 : index
    %8 = vector.load %arg4[%c0_6, %c0_7] : memref<21x10xf32, #tpu.memory_space<vmem>>, vector<21x10xf32>
    %cst_8 = arith.constant dense<0.000000e+00> : vector<64x10xf32>
    %9 = tpu.matmul %7, %8, %cst_8 {dimension_numbers = #tpu.dot_dimension_numbers<[1], [0], [0], [1], [0, 0, 1, 1], [], []>} : vector<64x21xf32>, vector<21x10xf32>, vector<64x10xf32> -> vector<64x10xf32>
    %c0_9 = arith.constant 0 : index
    %c0_10 = arith.constant 0 : index
    %10 = vector.load %arg5[%c0_9, %c0_10] : memref<1x10xf32, #tpu.memory_space<vmem>>, vector<1x10xf32>
    %11 = vector.broadcast %10 : vector<1x10xf32> to vector<64x10xf32>
    %12 = arith.addf %9, %11 : vector<64x10xf32>
    %cst_11 = arith.constant 0.000000e+00 : f32
    %13 = vector.broadcast %cst_11 : f32 to vector<64x10xf32>
    %14 = arith.maximumf %12, %13 : vector<64x10xf32>
    %c0_12 = arith.constant 0 : index
    %c0_13 = arith.constant 0 : index
    %15 = vector.load %arg6[%c0_12, %c0_13] : memref<10x21xf32, #tpu.memory_space<vmem>>, vector<10x21xf32>
    %cst_14 = arith.constant dense<0.000000e+00> : vector<64x21xf32>
    %16 = tpu.matmul %14, %15, %cst_14 {dimension_numbers = #tpu.dot_dimension_numbers<[1], [0], [0], [1], [0, 0, 1, 1], [], []>} : vector<64x10xf32>, vector<10x21xf32>, vector<64x21xf32> -> vector<64x21xf32>
    %c0_15 = arith.constant 0 : index
    %c0_16 = arith.constant 0 : index
    %17 = vector.load %arg7[%c0_15, %c0_16] : memref<1x21xf32, #tpu.memory_space<vmem>>, vector<1x21xf32>
    %18 = vector.broadcast %17 : vector<1x21xf32> to vector<64x21xf32>
    %19 = arith.addf %16, %18 : vector<64x21xf32>
    %cst_17 = arith.constant 0.000000e+00 : f32
    %20 = vector.broadcast %cst_17 : f32 to vector<64x21xf32>
    %21 = arith.maximumf %19, %20 : vector<64x21xf32>
    %c0_18 = arith.constant 0 : index
    %c0_19 = arith.constant 0 : index
    %22 = vector.load %arg8[%c0_18, %c0_19] : memref<21x32xf32, #tpu.memory_space<vmem>>, vector<21x32xf32>
    %cst_20 = arith.constant dense<0.000000e+00> : vector<64x32xf32>
    %23 = tpu.matmul %21, %22, %cst_20 {dimension_numbers = #tpu.dot_dimension_numbers<[1], [0], [0], [1], [0, 0, 1, 1], [], []>} : vector<64x21xf32>, vector<21x32xf32>, vector<64x32xf32> -> vector<64x32xf32>
    %c0_21 = arith.constant 0 : index
    %c0_22 = arith.constant 0 : index
    %24 = vector.load %arg9[%c0_21, %c0_22] : memref<1x32xf32, #tpu.memory_space<vmem>>, vector<1x32xf32>
    %25 = vector.broadcast %24 : vector<1x32xf32> to vector<64x32xf32>
    %26 = arith.addf %23, %25 : vector<64x32xf32>
    %cst_23 = arith.constant 0.000000e+00 : f32
    %27 = vector.broadcast %cst_23 : f32 to vector<64x32xf32>
    %28 = arith.maximumf %26, %27 : vector<64x32xf32>
    %c0_24 = arith.constant 0 : index
    %c0_25 = arith.constant 0 : index
    %29 = vector.load %arg10[%c0_24, %c0_25] : memref<64x32xf32, #tpu.memory_space<vmem>>, vector<64x32xf32>
    tpu.vector_store %arg10[%c0_24, %c0_25], %28 {strides = array<i32>} : memref<64x32xf32, #tpu.memory_space<vmem>>, vector<64x32xf32>,
    return
  }
  func.func @transform_0(%arg0: i32) -> (i32, i32) {
    %c0_i32 = arith.constant 0 : i32
    %c0_i32_0 = arith.constant 0 : i32
    return %arg0, %c0_i32 : i32, i32
  }
  func.func @transform_1(%arg0: i32) -> (i32, i32) {
    %c0_i32 = arith.constant 0 : i32
    %c0_i32_0 = arith.constant 0 : i32
    %c0_i32_1 = arith.constant 0 : i32
    return %c0_i32, %c0_i32_0 : i32, i32
  }
  func.func @transform_2(%arg0: i32) -> (i32, i32) {
    %c0_i32 = arith.constant 0 : i32
    %c0_i32_0 = arith.constant 0 : i32
    %c0_i32_1 = arith.constant 0 : i32
    return %c0_i32, %c0_i32_0 : i32, i32
  }
  func.func @transform_3(%arg0: i32) -> (i32, i32) {
    %c0_i32 = arith.constant 0 : i32
    %c0_i32_0 = arith.constant 0 : i32
    %c0_i32_1 = arith.constant 0 : i32
    return %c0_i32, %c0_i32_0 : i32, i32
  }
  func.func @transform_4(%arg0: i32) -> (i32, i32) {
    %c0_i32 = arith.constant 0 : i32
    %c0_i32_0 = arith.constant 0 : i32
    %c0_i32_1 = arith.constant 0 : i32
    return %c0_i32, %c0_i32_0 : i32, i32
  }
  func.func @transform_5(%arg0: i32) -> (i32, i32) {
    %c0_i32 = arith.constant 0 : i32
    %c0_i32_0 = arith.constant 0 : i32
    %c0_i32_1 = arith.constant 0 : i32
    return %c0_i32, %c0_i32_0 : i32, i32
  }
  func.func @transform_6(%arg0: i32) -> (i32, i32) {
    %c0_i32 = arith.constant 0 : i32
    %c0_i32_0 = arith.constant 0 : i32
    %c0_i32_1 = arith.constant 0 : i32
    return %c0_i32, %c0_i32_0 : i32, i32
  }
  func.func @transform_7(%arg0: i32) -> (i32, i32) {
    %c0_i32 = arith.constant 0 : i32
    %c0_i32_0 = arith.constant 0 : i32
    %c0_i32_1 = arith.constant 0 : i32
    return %c0_i32, %c0_i32_0 : i32, i32
  }
  func.func @transform_8(%arg0: i32) -> (i32, i32) {
    %c0_i32 = arith.constant 0 : i32
    %c0_i32_0 = arith.constant 0 : i32
    %c0_i32_1 = arith.constant 0 : i32
    return %c0_i32, %c0_i32_0 : i32, i32
  }
  func.func @transform_9(%arg0: i32) -> (i32, i32) {
    %c0_i32 = arith.constant 0 : i32
    %c0_i32_0 = arith.constant 0 : i32
    return %arg0, %c0_i32 : i32, i32
  }
}

module attributes {stable_mosaic.version = 11 : i64} {
  func.func @_autoencoder_kernel(%arg0: i32, %arg1: memref<64x32xf32, #tpu.memory_space<vmem>>, %arg2: memref<32x21xf32, #tpu.memory_space<vmem>>, %arg3: memref<1x21xf32, #tpu.memory_space<vmem>>, %arg4: memref<21x10xf32, #tpu.memory_space<vmem>>, %arg5: memref<1x10xf32, #tpu.memory_space<vmem>>, %arg6: memref<10x21xf32, #tpu.memory_space<vmem>>, %arg7: memref<1x21xf32, #tpu.memory_space<vmem>>, %arg8: memref<21x32xf32, #tpu.memory_space<vmem>>, %arg9: memref<1x32xf32, #tpu.memory_space<vmem>>, %arg10: memref<64x32xf32, #tpu.memory_space<vmem>>) attributes {dimension_semantics = [#tpu.dimension_semantics<parallel>], iteration_bounds = array<i64: 1>, scalar_prefetch = 0 : i64, scratch_operands = 0 : i64, tpu.core_type = #tpu.core_type<tc>, window_params = [{transform_indices = @transform_0, window_bounds = array<i64: 64, 32>}, {pipeline_mode = #tpu.pipeline_mode<synchronous>, transform_indices = @transform_1, window_bounds = array<i64: 32, 21>}, {pipeline_mode = #tpu.pipeline_mode<synchronous>, transform_indices = @transform_2, window_bounds = array<i64: 1, 21>}, {pipeline_mode = #tpu.pipeline_mode<synchronous>, transform_indices = @transform_3, window_bounds = array<i64: 21, 10>}, {pipeline_mode = #tpu.pipeline_mode<synchronous>, transform_indices = @transform_4, window_bounds = array<i64: 1, 10>}, {pipeline_mode = #tpu.pipeline_mode<synchronous>, transform_indices = @transform_5, window_bounds = array<i64: 10, 21>}, {pipeline_mode = #tpu.pipeline_mode<synchronous>, transform_indices = @transform_6, window_bounds = array<i64: 1, 21>}, {pipeline_mode = #tpu.pipeline_mode<synchronous>, transform_indices = @transform_7, window_bounds = array<i64: 21, 32>}, {pipeline_mode = #tpu.pipeline_mode<synchronous>, transform_indices = @transform_8, window_bounds = array<i64: 1, 32>}, {transform_indices = @transform_9, window_bounds = array<i64: 64, 32>}]} {
    %c0 = arith.constant 0 : index
    %c0_0 = arith.constant 0 : index
    %0 = vector.load %arg1[%c0, %c0_0] : memref<64x32xf32, #tpu.memory_space<vmem>>, vector<64x32xf32>
    %c0_1 = arith.constant 0 : index
    %c0_2 = arith.constant 0 : index
    %1 = vector.load %arg2[%c0_1, %c0_2] : memref<32x21xf32, #tpu.memory_space<vmem>>, vector<32x21xf32>
    %cst = arith.constant dense<0.000000e+00> : vector<64x21xf32>
    %2 = tpu.matmul %0, %1, %cst {dimension_numbers = #tpu.dot_dimension_numbers<[1], [0], [0], [1], [0, 0, 1, 1], [], []>} : vector<64x32xf32>, vector<32x21xf32>, vector<64x21xf32> -> vector<64x21xf32>
    %c0_3 = arith.constant 0 : index
    %c0_4 = arith.constant 0 : index
    %3 = vector.load %arg3[%c0_3, %c0_4] : memref<1x21xf32, #tpu.memory_space<vmem>>, vector<1x21xf32>
    %4 = vector.broadcast %3 : vector<1x21xf32> to vector<64x21xf32>
    %5 = arith.addf %2, %4 : vector<64x21xf32>
    %cst_5 = arith.constant 0.000000e+00 : f32
    %6 = vector.broadcast %cst_5 : f32 to vector<64x21xf32>
    %7 = arith.maximumf %5, %6 : vector<64x21xf32>
    %c0_6 = arith.constant 0 : index
    %c0_7 = arith.constant 0 : index
    %8 = vector.load %arg4[%c0_6, %c0_7] : memref<21x10xf32, #tpu.memory_space<vmem>>, vector<21x10xf32>
    %cst_8 = arith.constant dense<0.000000e+00> : vector<64x10xf32>
    %9 = tpu.matmul %7, %8, %cst_8 {dimension_numbers = #tpu.dot_dimension_numbers<[1], [0], [0], [1], [0, 0, 1, 1], [], []>} : vector<64x21xf32>, vector<21x10xf32>, vector<64x10xf32> -> vector<64x10xf32>
    %c0_9 = arith.constant 0 : index
    %c0_10 = arith.constant 0 : index
    %10 = vector.load %arg5[%c0_9, %c0_10] : memref<1x10xf32, #tpu.memory_space<vmem>>, vector<1x10xf32>
    %11 = vector.broadcast %10 : vector<1x10xf32> to vector<64x10xf32>
    %12 = arith.addf %9, %11 : vector<64x10xf32>
    %cst_11 = arith.constant 0.000000e+00 : f32
    %13 = vector.broadcast %cst_11 : f32 to vector<64x10xf32>
    %14 = arith.maximumf %12, %13 : vector<64x10xf32>
    %c0_12 = arith.constant 0 : index
    %c0_13 = arith.constant 0 : index
    %15 = vector.load %arg6[%c0_12, %c0_13] : memref<10x21xf32, #tpu.memory_space<vmem>>, vector<10x21xf32>
    %cst_14 = arith.constant dense<0.000000e+00> : vector<64x21xf32>
    %16 = tpu.matmul %14, %15, %cst_14 {dimension_numbers = #tpu.dot_dimension_numbers<[1], [0], [0], [1], [0, 0, 1, 1], [], []>} : vector<64x10xf32>, vector<10x21xf32>, vector<64x21xf32> -> vector<64x21xf32>
    %c0_15 = arith.constant 0 : index
    %c0_16 = arith.constant 0 : index
    %17 = vector.load %arg7[%c0_15, %c0_16] : memref<1x21xf32, #tpu.memory_space<vmem>>, vector<1x21xf32>
    %18 = vector.broadcast %17 : vector<1x21xf32> to vector<64x21xf32>
    %19 = arith.addf %16, %18 : vector<64x21xf32>
    %cst_17 = arith.constant 0.000000e+00 : f32
    %20 = vector.broadcast %cst_17 : f32 to vector<64x21xf32>
    %21 = arith.maximumf %19, %20 : vector<64x21xf32>
    %c0_18 = arith.constant 0 : index
    %c0_19 = arith.constant 0 : index
    %22 = vector.load %arg8[%c0_18, %c0_19] : memref<21x32xf32, #tpu.memory_space<vmem>>, vector<21x32xf32>
    %cst_20 = arith.constant dense<0.000000e+00> : vector<64x32xf32>
    %23 = tpu.matmul %21, %22, %cst_20 {dimension_numbers = #tpu.dot_dimension_numbers<[1], [0], [0], [1], [0, 0, 1, 1], [], []>} : vector<64x21xf32>, vector<21x32xf32>, vector<64x32xf32> -> vector<64x32xf32>
    %c0_21 = arith.constant 0 : index
    %c0_22 = arith.constant 0 : index
    %24 = vector.load %arg9[%c0_21, %c0_22] : memref<1x32xf32, #tpu.memory_space<vmem>>, vector<1x32xf32>
    %25 = vector.broadcast %24 : vector<1x32xf32> to vector<64x32xf32>
    %26 = arith.addf %23, %25 : vector<64x32xf32>
    %cst_23 = arith.constant 0.000000e+00 : f32
    %27 = vector.broadcast %cst_23 : f32 to vector<64x32xf32>
    %28 = arith.maximumf %26, %27 : vector<64x32xf32>
    %c0_24 = arith.constant 0 : index
    %c0_25 = arith.constant 0 : index
    %29 = vector.load %arg10[%c0_24, %c0_25] : memref<64x32xf32, #tpu.memory_space<vmem>>, vector<64x32xf32>
    tpu.vector_store %arg10[%c0_24, %c0_25], %28 {strides = array<i32>} : memref<64x32xf32, #tpu.memory_space<vmem>>, vector<64x32xf32>,
    return
  }
  func.func @transform_0(%arg0: i32) -> (i32, i32) {
    %c0_i32 = arith.constant 0 : i32
    %c0_i32_0 = arith.constant 0 : i32
    return %arg0, %c0_i32 : i32, i32
  }
  func.func @transform_1(%arg0: i32) -> (i32, i32) {
    %c0_i32 = arith.constant 0 : i32
    %c0_i32_0 = arith.constant 0 : i32
    %c0_i32_1 = arith.constant 0 : i32
    return %c0_i32, %c0_i32_0 : i32, i32
  }
  func.func @transform_2(%arg0: i32) -> (i32, i32) {
    %c0_i32 = arith.constant 0 : i32
    %c0_i32_0 = arith.constant 0 : i32
    %c0_i32_1 = arith.constant 0 : i32
    return %c0_i32, %c0_i32_0 : i32, i32
  }
  func.func @transform_3(%arg0: i32) -> (i32, i32) {
    %c0_i32 = arith.constant 0 : i32
    %c0_i32_0 = arith.constant 0 : i32
    %c0_i32_1 = arith.constant 0 : i32
    return %c0_i32, %c0_i32_0 : i32, i32
  }
  func.func @transform_4(%arg0: i32) -> (i32, i32) {
    %c0_i32 = arith.constant 0 : i32
    %c0_i32_0 = arith.constant 0 : i32
    %c0_i32_1 = arith.constant 0 : i32
    return %c0_i32, %c0_i32_0 : i32, i32
  }
  func.func @transform_5(%arg0: i32) -> (i32, i32) {
    %c0_i32 = arith.constant 0 : i32
    %c0_i32_0 = arith.constant 0 : i32
    %c0_i32_1 = arith.constant 0 : i32
    return %c0_i32, %c0_i32_0 : i32, i32
  }
  func.func @transform_6(%arg0: i32) -> (i32, i32) {
    %c0_i32 = arith.constant 0 : i32
    %c0_i32_0 = arith.constant 0 : i32
    %c0_i32_1 = arith.constant 0 : i32
    return %c0_i32, %c0_i32_0 : i32, i32
  }
  func.func @transform_7(%arg0: i32) -> (i32, i32) {
    %c0_i32 = arith.constant 0 : i32
    %c0_i32_0 = arith.constant 0 : i32
    %c0_i32_1 = arith.constant 0 : i32
    return %c0_i32, %c0_i32_0 : i32, i32
  }
  func.func @transform_8(%arg0: i32) -> (i32, i32) {
    %c0_i32 = arith.constant 0 : i32
    %c0_i32_0 = arith.constant 0 : i32
    %c0_i32_1 = arith.constant 0 : i32
    return %c0_i32, %c0_i32_0 : i32, i32
  }
  func.func @transform_9(%arg0: i32) -> (i32, i32) {
    %c0_i32 = arith.constant 0 : i32
    %c0_i32_0 = arith.constant 0 : i32
    return %arg0, %c0_i32 : i32, i32
  }
}

</mosaic_0001>

<bundles_post_ra>
// kernel: autoencoder_relu_forward.1
= control target key start
LH: loop header
LB: loop body
LE: loop exit
PB: predicated region body
PF: predicated region fallthrough
CT: control target
= control target key end

     0   :  { %vm48_vm0 = vcmask 261120   ;;  %vm154_vm1 = vcmask 1044480   ;;  %vm129_vm2 = vcmask 171008   ;;  %vm238_vm3 = vcmask 1041408   ;;  %s613_s1 = inlined_call_operand.vmem [shape: f32[32,21], index: 1, kind: input, shape index: {}]   ;;  %s614_s0 = inlined_call_operand.vmem [shape: f32[64,32], index: 0, kind: input, shape index: {}]   ;;  %s615_s2 = inlined_call_operand.vmem [shape: f32[1,21], index: 2, kind: input, shape index: {}]   ;;  %s616_s4 = inlined_call_operand.vmem [shape: f32[1,10], index: 4, kind: input, shape index: {}]   ;;  %s617_s3 = inlined_call_operand.vmem [shape: f32[21,10], index: 3, kind: input, shape index: {}]   ;;  %s618_s6 = inlined_call_operand.vmem [shape: f32[1,21], index: 6, kind: input, shape index: {}]   ;;  %s619_s5 = inlined_call_operand.vmem [shape: f32[10,21], index: 5, kind: input, shape index: {}]   ;;  %s620_s8 = inlined_call_operand.vmem [shape: f32[1,32], index: 8, kind: input, shape index: {}]   ;;  %s621_s7 = inlined_call_operand.vmem [shape: f32[21,32], index: 7, kind: input, shape index: {}]   ;;  %s622_s9 = inlined_call_operand.vmem [shape: f32[64,32], index: 9, kind: output, shape index: {}]  }
   0x1   :  { %v43_v0 = vld [vmem:[%s613_s1 + $0x18] sm:$0xff]  ;;  %v42_v1 = vld [vmem:[%s613_s1 + $0x10] sm:$0xff]  ;;  %v41_v2 = vld [vmem:[%s613_s1 + $0x8] sm:$0xff]  ;;  %vm213_vm4 = vcmask 80896  }
   0x2   :  { %85 = vmatpush.msra.mxu0 %v43_v0  ;;  %v40_v3 = vld [vmem:[%s613_s1] sm:$0xff]  ;;  %v33_v5 = vld [vmem:[%s614_s0 + $0x8] sm:$0xff]  ;;  %v34_v6 = vld [vmem:[%s614_s0 + $0x10] sm:$0xff] }
   0x3   :  { %v32_v4 = vld [vmem:[%s614_s0] sm:$0xff]  ;;  %v35_v7 = vld [vmem:[%s614_s0 + $0x18] sm:$0xff]  ;;  %v37_v9 = vld [vmem:[%s614_s0 + $0x28] sm:$0xff] }
   0x4   :  { %86 = vmatpush.msra.mxu0 %v42_v1  ;;  %v36_v8 = vld [vmem:[%s614_s0 + $0x20] sm:$0xff]  ;;  %v38_v10 = vld [vmem:[%s614_s0 + $0x30] sm:$0xff]  ;;  %v39_v11 = vld [vmem:[%s614_s0 + $0x38] sm:$0xff] }
   0x5   :  { %v124_v12 = vld [vmem:[%s617_s3 + $0x10] sm:$0x1f]  ;;  %v123_v13 = vld [vmem:[%s617_s3 + $0x8] sm:$0xff]  ;;  %v122_v14 = vld [vmem:[%s617_s3] sm:$0xff] }
   0x6   :  { %87 = vmatpush.msra.mxu0 %v41_v2  ;;  %394 = vmatpush.msk.msra.mxu1 %vm154_vm1, %v124_v12  ;;  %v421_v15 = vld [vmem:[%s615_s2] ss:$0 sm:$0xff]  ;;  %v208_v40 = vld [vmem:[%s619_s5 + $0x8] sm:$0x3] }
   0x7   :  { %403 = vmatpush.msk.msra.mxu2 %vm238_vm3, %v208_v40  ;;  %v207_v41 = vld [vmem:[%s619_s5] sm:$0xff] }
   0x8   :  { %88 = vmatpush.msra.mxu0 %v40_v3  ;;  %172 = vmatpush.msra.mxu1 %v123_v13  ;;  %v422_v42 = vld [vmem:[%s616_s4] ss:$0 sm:$0xff]  ;;  %v293_v3 = vld [vmem:[%s621_s7 + $0x10] sm:$0x1f] }
   0x9   :  { %386 = vmatmul.msk.f32.vlgmr.msra.gmra.mxu0 %vm48_vm0, %v32_v4  ;;  %257 = vmatpush.msra.mxu2 %v207_v41  ;;  %v292_v4 = vld [vmem:[%s621_s7 + $0x8] sm:$0xff] }
   0xa   :  { %173 = vmatpush.msra.mxu1 %v122_v14  ;;  %412 = vmatpush.msk.msra.mxu3 %vm154_vm1, %v293_v3 }
   0xc   :  { %339 = vmatpush.msra.mxu3 %v292_v4 }
  0x11   :  { %387 = vmatmul.msk.f32.gmra.mxu0 %vm48_vm0, %v33_v5  ;;  %v291_v5 = vld [vmem:[%s621_s7] sm:$0xff] }
  0x12   :  { %340 = vmatpush.msra.mxu3 %v291_v5 }
  0x19   :  { %388 = vmatmul.msk.f32.gmra.mxu0 %vm48_vm0, %v34_v6  ;;  %v423_v6 = vld [vmem:[%s618_s6] ss:$0 sm:$0xff] }
  0x21   :  { %389 = vmatmul.msk.f32.gmra.mxu0 %vm48_vm0, %v35_v7 }
  0x29   :  { %390 = vmatmul.msk.f32.gmra.mxu0 %vm48_vm0, %v36_v8 }
  0x31   :  { %391 = vmatmul.msk.f32.gmra.mxu0 %vm48_vm0, %v37_v9 }
  0x39   :  { %392 = vmatmul.msk.f32.gmra.mxu0 %vm48_vm0, %v38_v10 }
  0x41   :  { %393 = vmatmul.msk.f32.gmra.mxu0 %vm48_vm0, %v39_v11 }
  0x86   :  { %v90_v16 = vpop.f32.mrf.mxu0 }
  0x87   :  { %v91_v17 = vadd.f32 %v421_v15, %v90_v16 }
  0x89   :  { %v114_v18 = vmax.f32 %v91_v17, 0.0 }
  0x8b   :  { %395 = vmatmul.msk.f32.vlgmr.msra.gmra.mxu1 %vm129_vm2, %v114_v18 }
  0x8e   :  { %v93_v19 = vpop.f32.mrf.mxu0 }
  0x8f   :  { %v94_v20 = vadd.f32 %v421_v15, %v93_v19 }
  0x91   :  { %v115_v21 = vmax.f32 %v94_v20, 0.0 }
  0x93   :  { %396 = vmatmul.msk.f32.gmra.mxu1 %vm129_vm2, %v115_v21 }
  0x96   :  { %v96_v22 = vpop.f32.mrf.mxu0 }
  0x97   :  { %v97_v23 = vadd.f32 %v421_v15, %v96_v22 }
  0x99   :  { %v116_v24 = vmax.f32 %v97_v23, 0.0 }
  0x9b   :  { %397 = vmatmul.msk.f32.gmra.mxu1 %vm129_vm2, %v116_v24 }
  0x9e   :  { %v99_v25 = vpop.f32.mrf.mxu0 }
  0x9f   :  { %v100_v26 = vadd.f32 %v421_v15, %v99_v25 }
  0xa1   :  { %v117_v27 = vmax.f32 %v100_v26, 0.0 }
  0xa3   :  { %398 = vmatmul.msk.f32.gmra.mxu1 %vm129_vm2, %v117_v27 }
  0xa6   :  { %v102_v28 = vpop.f32.mrf.mxu0 }
  0xa7   :  { %v103_v29 = vadd.f32 %v421_v15, %v102_v28 }
  0xa9   :  { %v118_v30 = vmax.f32 %v103_v29, 0.0 }
  0xab   :  { %399 = vmatmul.msk.f32.gmra.mxu1 %vm129_vm2, %v118_v30 }
  0xae   :  { %v105_v31 = vpop.f32.mrf.mxu0 }
  0xaf   :  { %v106_v32 = vadd.f32 %v421_v15, %v105_v31  ;;  %v424_v31 = vld [vmem:[%s620_s8] ss:$0 sm:$0xff] }
  0xb1   :  { %v119_v33 = vmax.f32 %v106_v32, 0.0 }
  0xb3   :  { %400 = vmatmul.msk.f32.gmra.mxu1 %vm129_vm2, %v119_v33 }
  0xb6   :  { %v108_v34 = vpop.f32.mrf.mxu0 }
  0xb7   :  { %v109_v35 = vadd.f32 %v421_v15, %v108_v34 }
  0xb9   :  { %v120_v36 = vmax.f32 %v109_v35, 0.0 }
  0xbb   :  { %401 = vmatmul.msk.f32.gmra.mxu1 %vm129_vm2, %v120_v36 }
  0xbe   :  { %v111_v37 = vpop.f32.mrf.mxu0 }
  0xbf   :  { %v112_v38 = vadd.f32 %v421_v15, %v111_v37 }
  0xc1   :  { %v121_v39 = vmax.f32 %v112_v38, 0.0 }
  0xc3   :  { %402 = vmatmul.msk.f32.gmra.mxu1 %vm129_vm2, %v121_v39 }
 0x108   :  { %v175_v43 = vpop.f32.mrf.mxu1 }
 0x109   :  { %v176_v44 = vadd.f32 %v422_v42, %v175_v43 }
 0x10b   :  { %v199_v45 = vmax.f32 %v176_v44, 0.0 }
 0x10d   :  { %404 = vmatmul.msk.f32.vlgmr.msra.gmra.mxu2 %vm213_vm4, %v199_v45 }
 0x110   :  { %v178_v46 = vpop.f32.mrf.mxu1 }
 0x111   :  { %v179_v47 = vadd.f32 %v422_v42, %v178_v46 }
 0x113   :  { %v200_v48 = vmax.f32 %v179_v47, 0.0 }
 0x115   :  { %405 = vmatmul.msk.f32.gmra.mxu2 %vm213_vm4, %v200_v48 }
 0x118   :  { %v181_v49 = vpop.f32.mrf.mxu1 }
 0x119   :  { %v182_v50 = vadd.f32 %v422_v42, %v181_v49 }
 0x11b   :  { %v201_v51 = vmax.f32 %v182_v50, 0.0 }
 0x11d   :  { %406 = vmatmul.msk.f32.gmra.mxu2 %vm213_vm4, %v201_v51 }
 0x120   :  { %v184_v52 = vpop.f32.mrf.mxu1 }
 0x121   :  { %v185_v53 = vadd.f32 %v422_v42, %v184_v52 }
 0x123   :  { %v202_v54 = vmax.f32 %v185_v53, 0.0 }
 0x125   :  { %407 = vmatmul.msk.f32.gmra.mxu2 %vm213_vm4, %v202_v54 }
 0x128   :  { %v187_v55 = vpop.f32.mrf.mxu1 }
 0x129   :  { %v188_v56 = vadd.f32 %v422_v42, %v187_v55 }
 0x12b   :  { %v203_v57 = vmax.f32 %v188_v56, 0.0 }
 0x12d   :  { %408 = vmatmul.msk.f32.gmra.mxu2 %vm213_vm4, %v203_v57 }
 0x130   :  { %v190_v58 = vpop.f32.mrf.mxu1 }
 0x131   :  { %v191_v59 = vadd.f32 %v422_v42, %v190_v58 }
 0x133   :  { %v204_v60 = vmax.f32 %v191_v59, 0.0 }
 0x135   :  { %409 = vmatmul.msk.f32.gmra.mxu2 %vm213_vm4, %v204_v60 }
 0x138   :  { %v193_v61 = vpop.f32.mrf.mxu1 }
 0x139   :  { %v194_v62 = vadd.f32 %v422_v42, %v193_v61 }
 0x13b   :  { %v205_v63 = vmax.f32 %v194_v62, 0.0 }
 0x13d   :  { %410 = vmatmul.msk.f32.gmra.mxu2 %vm213_vm4, %v205_v63 }
 0x140   :  { %v196_v0 = vpop.f32.mrf.mxu1 }
 0x141   :  { %v197_v1 = vadd.f32 %v422_v42, %v196_v0 }
 0x143   :  { %v206_v2 = vmax.f32 %v197_v1, 0.0 }
 0x145   :  { %411 = vmatmul.msk.f32.gmra.mxu2 %vm213_vm4, %v206_v2 }
 0x190   :  { %v259_v7 = vpop.f32.mrf.mxu2 }
 0x191   :  { %v260_v8 = vadd.f32 %v423_v6, %v259_v7 }
 0x193   :  { %v283_v9 = vmax.f32 %v260_v8, 0.0 }
 0x195   :  { %413 = vmatmul.msk.f32.vlgmr.msra.gmra.mxu3 %vm129_vm2, %v283_v9 }
 0x198   :  { %v262_v10 = vpop.f32.mrf.mxu2 }
 0x199   :  { %v263_v11 = vadd.f32 %v423_v6, %v262_v10 }
 0x19b   :  { %v284_v12 = vmax.f32 %v263_v11, 0.0 }
 0x19d   :  { %414 = vmatmul.msk.f32.gmra.mxu3 %vm129_vm2, %v284_v12 }
 0x1a0   :  { %v265_v13 = vpop.f32.mrf.mxu2 }
 0x1a1   :  { %v266_v14 = vadd.f32 %v423_v6, %v265_v13 }
 0x1a3   :  { %v285_v15 = vmax.f32 %v266_v14, 0.0 }
 0x1a5   :  { %415 = vmatmul.msk.f32.gmra.mxu3 %vm129_vm2, %v285_v15 }
 0x1a8   :  { %v268_v16 = vpop.f32.mrf.mxu2 }
 0x1a9   :  { %v269_v17 = vadd.f32 %v423_v6, %v268_v16 }
 0x1ab   :  { %v286_v18 = vmax.f32 %v269_v17, 0.0 }
 0x1ad   :  { %416 = vmatmul.msk.f32.gmra.mxu3 %vm129_vm2, %v286_v18 }
 0x1b0   :  { %v271_v19 = vpop.f32.mrf.mxu2 }
 0x1b1   :  { %v272_v20 = vadd.f32 %v423_v6, %v271_v19 }
 0x1b3   :  { %v287_v21 = vmax.f32 %v272_v20, 0.0 }
 0x1b5   :  { %417 = vmatmul.msk.f32.gmra.mxu3 %vm129_vm2, %v287_v21 }
 0x1b8   :  { %v274_v22 = vpop.f32.mrf.mxu2 }
 0x1b9   :  { %v275_v23 = vadd.f32 %v423_v6, %v274_v22 }
 0x1bb   :  { %v288_v24 = vmax.f32 %v275_v23, 0.0 }
 0x1bd   :  { %418 = vmatmul.msk.f32.gmra.mxu3 %vm129_vm2, %v288_v24 }
 0x1c0   :  { %v277_v25 = vpop.f32.mrf.mxu2 }
 0x1c1   :  { %v278_v26 = vadd.f32 %v423_v6, %v277_v25 }
 0x1c3   :  { %v289_v27 = vmax.f32 %v278_v26, 0.0 }
 0x1c5   :  { %419 = vmatmul.msk.f32.gmra.mxu3 %vm129_vm2, %v289_v27 }
 0x1c8   :  { %v280_v28 = vpop.f32.mrf.mxu2 }
 0x1c9   :  { %v281_v29 = vadd.f32 %v423_v6, %v280_v28 }
 0x1cb   :  { %v290_v30 = vmax.f32 %v281_v29, 0.0 }
 0x1cd   :  { %420 = vmatmul.msk.f32.gmra.mxu3 %vm129_vm2, %v290_v30 }
 0x218   :  { %v342_v32 = vpop.f32.mrf.mxu3 }
 0x219   :  { %v343_v33 = vadd.f32 %v424_v31, %v342_v32 }
 0x21b   :  { %v366_v34 = vmax.f32 %v343_v33, 0.0 }
 0x21d   :  { %374 = vst.msk [vmem:[%s622_s9] sm:$0xff] %vm48_vm0, %v366_v34 }
 0x220   :  { %v345_v35 = vpop.f32.mrf.mxu3 }
 0x221   :  { %v346_v36 = vadd.f32 %v424_v31, %v345_v35 }
 0x223   :  { %v367_v37 = vmax.f32 %v346_v36, 0.0 }
 0x225   :  { %375 = vst.msk [vmem:[%s622_s9 + $0x8] sm:$0xff] %vm48_vm0, %v367_v37 }
 0x228   :  { %v348_v38 = vpop.f32.mrf.mxu3 }
 0x229   :  { %v349_v39 = vadd.f32 %v424_v31, %v348_v38 }
 0x22b   :  { %v368_v40 = vmax.f32 %v349_v39, 0.0 }
 0x22d   :  { %376 = vst.msk [vmem:[%s622_s9 + $0x10] sm:$0xff] %vm48_vm0, %v368_v40 }
 0x230   :  { %v351_v41 = vpop.f32.mrf.mxu3 }
 0x231   :  { %v352_v42 = vadd.f32 %v424_v31, %v351_v41 }
 0x233   :  { %v369_v43 = vmax.f32 %v352_v42, 0.0 }
 0x235   :  { %377 = vst.msk [vmem:[%s622_s9 + $0x18] sm:$0xff] %vm48_vm0, %v369_v43 }
 0x238   :  { %v354_v44 = vpop.f32.mrf.mxu3 }
 0x239   :  { %v355_v45 = vadd.f32 %v424_v31, %v354_v44 }
 0x23b   :  { %v370_v46 = vmax.f32 %v355_v45, 0.0 }
 0x23d   :  { %378 = vst.msk [vmem:[%s622_s9 + $0x20] sm:$0xff] %vm48_vm0, %v370_v46 }
 0x240   :  { %v357_v47 = vpop.f32.mrf.mxu3 }
 0x241   :  { %v358_v48 = vadd.f32 %v424_v31, %v357_v47 }
 0x243   :  { %v371_v49 = vmax.f32 %v358_v48, 0.0 }
 0x245   :  { %379 = vst.msk [vmem:[%s622_s9 + $0x28] sm:$0xff] %vm48_vm0, %v371_v49 }
 0x248   :  { %v360_v50 = vpop.f32.mrf.mxu3 }
 0x249   :  { %v361_v51 = vadd.f32 %v424_v31, %v360_v50 }
 0x24b   :  { %v372_v52 = vmax.f32 %v361_v51, 0.0 }
 0x24d   :  { %380 = vst.msk [vmem:[%s622_s9 + $0x30] sm:$0xff] %vm48_vm0, %v372_v52 }
 0x250   :  { %v363_v53 = vpop.f32.mrf.mxu3 }
 0x251   :  { %v364_v54 = vadd.f32 %v424_v31, %v363_v53 }
 0x253   :  { %v373_v55 = vmax.f32 %v364_v54, 0.0 }
 0x255   :  { %381 = vst.msk [vmem:[%s622_s9 + $0x38] sm:$0xff] %vm48_vm0, %v373_v55 }

// kernel: autoencoder_relu_forward.1
= control target key start
LH: loop header
LB: loop body
LE: loop exit
PB: predicated region body
PF: predicated region fallthrough
CT: control target
= control target key end

     0   :  { %vm48_vm0 = vcmask 261120   ;;  %vm154_vm1 = vcmask 1044480   ;;  %vm129_vm2 = vcmask 171008   ;;  %vm238_vm3 = vcmask 1041408   ;;  %s613_s1 = inlined_call_operand.vmem [shape: f32[32,21], index: 1, kind: input, shape index: {}]   ;;  %s614_s0 = inlined_call_operand.vmem [shape: f32[64,32], index: 0, kind: input, shape index: {}]   ;;  %s615_s2 = inlined_call_operand.vmem [shape: f32[1,21], index: 2, kind: input, shape index: {}]   ;;  %s616_s4 = inlined_call_operand.vmem [shape: f32[1,10], index: 4, kind: input, shape index: {}]   ;;  %s617_s3 = inlined_call_operand.vmem [shape: f32[21,10], index: 3, kind: input, shape index: {}]   ;;  %s618_s6 = inlined_call_operand.vmem [shape: f32[1,21], index: 6, kind: input, shape index: {}]   ;;  %s619_s5 = inlined_call_operand.vmem [shape: f32[10,21], index: 5, kind: input, shape index: {}]   ;;  %s620_s8 = inlined_call_operand.vmem [shape: f32[1,32], index: 8, kind: input, shape index: {}]   ;;  %s621_s7 = inlined_call_operand.vmem [shape: f32[21,32], index: 7, kind: input, shape index: {}]   ;;  %s622_s9 = inlined_call_operand.vmem [shape: f32[64,32], index: 9, kind: output, shape index: {}]  }
   0x1   :  { %v43_v0 = vld [vmem:[%s613_s1 + $0x18] sm:$0xff]  ;;  %v42_v1 = vld [vmem:[%s613_s1 + $0x10] sm:$0xff]  ;;  %v41_v2 = vld [vmem:[%s613_s1 + $0x8] sm:$0xff]  ;;  %vm213_vm4 = vcmask 80896  }
   0x2   :  { %85 = vmatpush.msra.mxu0 %v43_v0  ;;  %v40_v3 = vld [vmem:[%s613_s1] sm:$0xff]  ;;  %v33_v5 = vld [vmem:[%s614_s0 + $0x8] sm:$0xff]  ;;  %v34_v6 = vld [vmem:[%s614_s0 + $0x10] sm:$0xff] }
   0x3   :  { %v32_v4 = vld [vmem:[%s614_s0] sm:$0xff]  ;;  %v35_v7 = vld [vmem:[%s614_s0 + $0x18] sm:$0xff]  ;;  %v37_v9 = vld [vmem:[%s614_s0 + $0x28] sm:$0xff] }
   0x4   :  { %86 = vmatpush.msra.mxu0 %v42_v1  ;;  %v36_v8 = vld [vmem:[%s614_s0 + $0x20] sm:$0xff]  ;;  %v38_v10 = vld [vmem:[%s614_s0 + $0x30] sm:$0xff]  ;;  %v39_v11 = vld [vmem:[%s614_s0 + $0x38] sm:$0xff] }
   0x5   :  { %v124_v12 = vld [vmem:[%s617_s3 + $0x10] sm:$0x1f]  ;;  %v123_v13 = vld [vmem:[%s617_s3 + $0x8] sm:$0xff]  ;;  %v122_v14 = vld [vmem:[%s617_s3] sm:$0xff] }
   0x6   :  { %87 = vmatpush.msra.mxu0 %v41_v2  ;;  %394 = vmatpush.msk.msra.mxu1 %vm154_vm1, %v124_v12  ;;  %v421_v15 = vld [vmem:[%s615_s2] ss:$0 sm:$0xff]  ;;  %v208_v40 = vld [vmem:[%s619_s5 + $0x8] sm:$0x3] }
   0x7   :  { %403 = vmatpush.msk.msra.mxu2 %vm238_vm3, %v208_v40  ;;  %v207_v41 = vld [vmem:[%s619_s5] sm:$0xff] }
   0x8   :  { %88 = vmatpush.msra.mxu0 %v40_v3  ;;  %172 = vmatpush.msra.mxu1 %v123_v13  ;;  %v422_v42 = vld [vmem:[%s616_s4] ss:$0 sm:$0xff]  ;;  %v293_v3 = vld [vmem:[%s621_s7 + $0x10] sm:$0x1f] }
   0x9   :  { %386 = vmatmul.msk.f32.vlgmr.msra.gmra.mxu0 %vm48_vm0, %v32_v4  ;;  %257 = vmatpush.msra.mxu2 %v207_v41  ;;  %v292_v4 = vld [vmem:[%s621_s7 + $0x8] sm:$0xff] }
   0xa   :  { %173 = vmatpush.msra.mxu1 %v122_v14  ;;  %412 = vmatpush.msk.msra.mxu3 %vm154_vm1, %v293_v3 }
   0xc   :  { %339 = vmatpush.msra.mxu3 %v292_v4 }
  0x11   :  { %387 = vmatmul.msk.f32.gmra.mxu0 %vm48_vm0, %v33_v5  ;;  %v291_v5 = vld [vmem:[%s621_s7] sm:$0xff] }
  0x12   :  { %340 = vmatpush.msra.mxu3 %v291_v5 }
  0x19   :  { %388 = vmatmul.msk.f32.gmra.mxu0 %vm48_vm0, %v34_v6  ;;  %v423_v6 = vld [vmem:[%s618_s6] ss:$0 sm:$0xff] }
  0x21   :  { %389 = vmatmul.msk.f32.gmra.mxu0 %vm48_vm0, %v35_v7 }
  0x29   :  { %390 = vmatmul.msk.f32.gmra.mxu0 %vm48_vm0, %v36_v8 }
  0x31   :  { %391 = vmatmul.msk.f32.gmra.mxu0 %vm48_vm0, %v37_v9 }
  0x39   :  { %392 = vmatmul.msk.f32.gmra.mxu0 %vm48_vm0, %v38_v10 }
  0x41   :  { %393 = vmatmul.msk.f32.gmra.mxu0 %vm48_vm0, %v39_v11 }
  0x86   :  { %v90_v16 = vpop.f32.mrf.mxu0 }
  0x87   :  { %v91_v17 = vadd.f32 %v421_v15, %v90_v16 }
  0x89   :  { %v114_v18 = vmax.f32 %v91_v17, 0.0 }
  0x8b   :  { %395 = vmatmul.msk.f32.vlgmr.msra.gmra.mxu1 %vm129_vm2, %v114_v18 }
  0x8e   :  { %v93_v19 = vpop.f32.mrf.mxu0 }
  0x8f   :  { %v94_v20 = vadd.f32 %v421_v15, %v93_v19 }
  0x91   :  { %v115_v21 = vmax.f32 %v94_v20, 0.0 }
  0x93   :  { %396 = vmatmul.msk.f32.gmra.mxu1 %vm129_vm2, %v115_v21 }
  0x96   :  { %v96_v22 = vpop.f32.mrf.mxu0 }
  0x97   :  { %v97_v23 = vadd.f32 %v421_v15, %v96_v22 }
  0x99   :  { %v116_v24 = vmax.f32 %v97_v23, 0.0 }
  0x9b   :  { %397 = vmatmul.msk.f32.gmra.mxu1 %vm129_vm2, %v116_v24 }
  0x9e   :  { %v99_v25 = vpop.f32.mrf.mxu0 }
  0x9f   :  { %v100_v26 = vadd.f32 %v421_v15, %v99_v25 }
  0xa1   :  { %v117_v27 = vmax.f32 %v100_v26, 0.0 }
  0xa3   :  { %398 = vmatmul.msk.f32.gmra.mxu1 %vm129_vm2, %v117_v27 }
  0xa6   :  { %v102_v28 = vpop.f32.mrf.mxu0 }
  0xa7   :  { %v103_v29 = vadd.f32 %v421_v15, %v102_v28 }
  0xa9   :  { %v118_v30 = vmax.f32 %v103_v29, 0.0 }
  0xab   :  { %399 = vmatmul.msk.f32.gmra.mxu1 %vm129_vm2, %v118_v30 }
  0xae   :  { %v105_v31 = vpop.f32.mrf.mxu0 }
  0xaf   :  { %v106_v32 = vadd.f32 %v421_v15, %v105_v31  ;;  %v424_v31 = vld [vmem:[%s620_s8] ss:$0 sm:$0xff] }
  0xb1   :  { %v119_v33 = vmax.f32 %v106_v32, 0.0 }
  0xb3   :  { %400 = vmatmul.msk.f32.gmra.mxu1 %vm129_vm2, %v119_v33 }
  0xb6   :  { %v108_v34 = vpop.f32.mrf.mxu0 }
  0xb7   :  { %v109_v35 = vadd.f32 %v421_v15, %v108_v34 }
  0xb9   :  { %v120_v36 = vmax.f32 %v109_v35, 0.0 }
  0xbb   :  { %401 = vmatmul.msk.f32.gmra.mxu1 %vm129_vm2, %v120_v36 }
  0xbe   :  { %v111_v37 = vpop.f32.mrf.mxu0 }
  0xbf   :  { %v112_v38 = vadd.f32 %v421_v15, %v111_v37 }
  0xc1   :  { %v121_v39 = vmax.f32 %v112_v38, 0.0 }
  0xc3   :  { %402 = vmatmul.msk.f32.gmra.mxu1 %vm129_vm2, %v121_v39 }
 0x108   :  { %v175_v43 = vpop.f32.mrf.mxu1 }
 0x109   :  { %v176_v44 = vadd.f32 %v422_v42, %v175_v43 }
 0x10b   :  { %v199_v45 = vmax.f32 %v176_v44, 0.0 }
 0x10d   :  { %404 = vmatmul.msk.f32.vlgmr.msra.gmra.mxu2 %vm213_vm4, %v199_v45 }
 0x110   :  { %v178_v46 = vpop.f32.mrf.mxu1 }
 0x111   :  { %v179_v47 = vadd.f32 %v422_v42, %v178_v46 }
 0x113   :  { %v200_v48 = vmax.f32 %v179_v47, 0.0 }
 0x115   :  { %405 = vmatmul.msk.f32.gmra.mxu2 %vm213_vm4, %v200_v48 }
 0x118   :  { %v181_v49 = vpop.f32.mrf.mxu1 }
 0x119   :  { %v182_v50 = vadd.f32 %v422_v42, %v181_v49 }
 0x11b   :  { %v201_v51 = vmax.f32 %v182_v50, 0.0 }
 0x11d   :  { %406 = vmatmul.msk.f32.gmra.mxu2 %vm213_vm4, %v201_v51 }
 0x120   :  { %v184_v52 = vpop.f32.mrf.mxu1 }
 0x121   :  { %v185_v53 = vadd.f32 %v422_v42, %v184_v52 }
 0x123   :  { %v202_v54 = vmax.f32 %v185_v53, 0.0 }
 0x125   :  { %407 = vmatmul.msk.f32.gmra.mxu2 %vm213_vm4, %v202_v54 }
 0x128   :  { %v187_v55 = vpop.f32.mrf.mxu1 }
 0x129   :  { %v188_v56 = vadd.f32 %v422_v42, %v187_v55 }
 0x12b   :  { %v203_v57 = vmax.f32 %v188_v56, 0.0 }
 0x12d   :  { %408 = vmatmul.msk.f32.gmra.mxu2 %vm213_vm4, %v203_v57 }
 0x130   :  { %v190_v58 = vpop.f32.mrf.mxu1 }
 0x131   :  { %v191_v59 = vadd.f32 %v422_v42, %v190_v58 }
 0x133   :  { %v204_v60 = vmax.f32 %v191_v59, 0.0 }
 0x135   :  { %409 = vmatmul.msk.f32.gmra.mxu2 %vm213_vm4, %v204_v60 }
 0x138   :  { %v193_v61 = vpop.f32.mrf.mxu1 }
 0x139   :  { %v194_v62 = vadd.f32 %v422_v42, %v193_v61 }
 0x13b   :  { %v205_v63 = vmax.f32 %v194_v62, 0.0 }
 0x13d   :  { %410 = vmatmul.msk.f32.gmra.mxu2 %vm213_vm4, %v205_v63 }
 0x140   :  { %v196_v0 = vpop.f32.mrf.mxu1 }
 0x141   :  { %v197_v1 = vadd.f32 %v422_v42, %v196_v0 }
 0x143   :  { %v206_v2 = vmax.f32 %v197_v1, 0.0 }
 0x145   :  { %411 = vmatmul.msk.f32.gmra.mxu2 %vm213_vm4, %v206_v2 }
 0x190   :  { %v259_v7 = vpop.f32.mrf.mxu2 }
 0x191   :  { %v260_v8 = vadd.f32 %v423_v6, %v259_v7 }
 0x193   :  { %v283_v9 = vmax.f32 %v260_v8, 0.0 }
 0x195   :  { %413 = vmatmul.msk.f32.vlgmr.msra.gmra.mxu3 %vm129_vm2, %v283_v9 }
 0x198   :  { %v262_v10 = vpop.f32.mrf.mxu2 }
 0x199   :  { %v263_v11 = vadd.f32 %v423_v6, %v262_v10 }
 0x19b   :  { %v284_v12 = vmax.f32 %v263_v11, 0.0 }
 0x19d   :  { %414 = vmatmul.msk.f32.gmra.mxu3 %vm129_vm2, %v284_v12 }
 0x1a0   :  { %v265_v13 = vpop.f32.mrf.mxu2 }
 0x1a1   :  { %v266_v14 = vadd.f32 %v423_v6, %v265_v13 }
 0x1a3   :  { %v285_v15 = vmax.f32 %v266_v14, 0.0 }
 0x1a5   :  { %415 = vmatmul.msk.f32.gmra.mxu3 %vm129_vm2, %v285_v15 }
 0x1a8   :  { %v268_v16 = vpop.f32.mrf.mxu2 }
 0x1a9   :  { %v269_v17 = vadd.f32 %v423_v6, %v268_v16 }
 0x1ab   :  { %v286_v18 = vmax.f32 %v269_v17, 0.0 }
 0x1ad   :  { %416 = vmatmul.msk.f32.gmra.mxu3 %vm129_vm2, %v286_v18 }
 0x1b0   :  { %v271_v19 = vpop.f32.mrf.mxu2 }
 0x1b1   :  { %v272_v20 = vadd.f32 %v423_v6, %v271_v19 }
 0x1b3   :  { %v287_v21 = vmax.f32 %v272_v20, 0.0 }
 0x1b5   :  { %417 = vmatmul.msk.f32.gmra.mxu3 %vm129_vm2, %v287_v21 }
 0x1b8   :  { %v274_v22 = vpop.f32.mrf.mxu2 }
 0x1b9   :  { %v275_v23 = vadd.f32 %v423_v6, %v274_v22 }
 0x1bb   :  { %v288_v24 = vmax.f32 %v275_v23, 0.0 }
 0x1bd   :  { %418 = vmatmul.msk.f32.gmra.mxu3 %vm129_vm2, %v288_v24 }
 0x1c0   :  { %v277_v25 = vpop.f32.mrf.mxu2 }
 0x1c1   :  { %v278_v26 = vadd.f32 %v423_v6, %v277_v25 }
 0x1c3   :  { %v289_v27 = vmax.f32 %v278_v26, 0.0 }
 0x1c5   :  { %419 = vmatmul.msk.f32.gmra.mxu3 %vm129_vm2, %v289_v27 }
 0x1c8   :  { %v280_v28 = vpop.f32.mrf.mxu2 }
 0x1c9   :  { %v281_v29 = vadd.f32 %v423_v6, %v280_v28 }
 0x1cb   :  { %v290_v30 = vmax.f32 %v281_v29, 0.0 }
 0x1cd   :  { %420 = vmatmul.msk.f32.gmra.mxu3 %vm129_vm2, %v290_v30 }
 0x218   :  { %v342_v32 = vpop.f32.mrf.mxu3 }
 0x219   :  { %v343_v33 = vadd.f32 %v424_v31, %v342_v32 }
 0x21b   :  { %v366_v34 = vmax.f32 %v343_v33, 0.0 }
 0x21d   :  { %374 = vst.msk [vmem:[%s622_s9] sm:$0xff] %vm48_vm0, %v366_v34 }
 0x220   :  { %v345_v35 = vpop.f32.mrf.mxu3 }
 0x221   :  { %v346_v36 = vadd.f32 %v424_v31, %v345_v35 }
 0x223   :  { %v367_v37 = vmax.f32 %v346_v36, 0.0 }
 0x225   :  { %375 = vst.msk [vmem:[%s622_s9 + $0x8] sm:$0xff] %vm48_vm0, %v367_v37 }
 0x228   :  { %v348_v38 = vpop.f32.mrf.mxu3 }
 0x229   :  { %v349_v39 = vadd.f32 %v424_v31, %v348_v38 }
 0x22b   :  { %v368_v40 = vmax.f32 %v349_v39, 0.0 }
 0x22d   :  { %376 = vst.msk [vmem:[%s622_s9 + $0x10] sm:$0xff] %vm48_vm0, %v368_v40 }
 0x230   :  { %v351_v41 = vpop.f32.mrf.mxu3 }
 0x231   :  { %v352_v42 = vadd.f32 %v424_v31, %v351_v41 }
 0x233   :  { %v369_v43 = vmax.f32 %v352_v42, 0.0 }
 0x235   :  { %377 = vst.msk [vmem:[%s622_s9 + $0x18] sm:$0xff] %vm48_vm0, %v369_v43 }
 0x238   :  { %v354_v44 = vpop.f32.mrf.mxu3 }
 0x239   :  { %v355_v45 = vadd.f32 %v424_v31, %v354_v44 }
 0x23b   :  { %v370_v46 = vmax.f32 %v355_v45, 0.0 }
 0x23d   :  { %378 = vst.msk [vmem:[%s622_s9 + $0x20] sm:$0xff] %vm48_vm0, %v370_v46 }
 0x240   :  { %v357_v47 = vpop.f32.mrf.mxu3 }
 0x241   :  { %v358_v48 = vadd.f32 %v424_v31, %v357_v47 }
 0x243   :  { %v371_v49 = vmax.f32 %v358_v48, 0.0 }
 0x245   :  { %379 = vst.msk [vmem:[%s622_s9 + $0x28] sm:$0xff] %vm48_vm0, %v371_v49 }
 0x248   :  { %v360_v50 = vpop.f32.mrf.mxu3 }
 0x249   :  { %v361_v51 = vadd.f32 %v424_v31, %v360_v50 }
 0x24b   :  { %v372_v52 = vmax.f32 %v361_v51, 0.0 }
 0x24d   :  { %380 = vst.msk [vmem:[%s622_s9 + $0x30] sm:$0xff] %vm48_vm0, %v372_v52 }
 0x250   :  { %v363_v53 = vpop.f32.mrf.mxu3 }
 0x251   :  { %v364_v54 = vadd.f32 %v424_v31, %v363_v53 }
 0x253   :  { %v373_v55 = vmax.f32 %v364_v54, 0.0 }
 0x255   :  { %381 = vst.msk [vmem:[%s622_s9 + $0x38] sm:$0xff] %vm48_vm0, %v373_v55 }

</bundles_post_ra>
